<compile_context>
chip_gen: v7x
topology: tpu7x:2x2x1
jax: 0.10.0
libtpu: 0.0.40
codegen_flags: <defaults>
</compile_context>

<pallas_src>
import functools

import jax
import jax.numpy as jnp
from jax.experimental import pallas as pl
from jax.experimental.pallas import tpu as pltpu


def _round_up(n, m):
    return ((n + m - 1) // m) * m


def _apply_act(h, act, slope):
    if act == "lrelu":
        return jnp.where(h > 0, h, slope * h)
    elif act == "xtanh":
        return jnp.tanh(h) + slope * h
    elif act == "sigmoid":
        return 1.0 / (1.0 + jnp.exp(-h))  # explicit form: EUP exp + VPU (robust Mosaic lowering)
    elif act == "none":
        return h
    else:
        raise ValueError(f"Incorrect activation: {act}")


def mlp_kernel(*refs, n_layers, acts, slope, op_dtype):
    """refs = (x_ref, w0, b0, w1, b1, ..., w_{L-1}, b_{L-1}, out_ref).

    Weights are pre-transposed: w has shape (in, out); bias is (1, out) in f32.
    """
    x_ref = refs[0]
    out_ref = refs[-1]
    param_refs = refs[1:-1]

    h = x_ref[...].astype(op_dtype)          # MXU-native operand dtype (bf16 by default)
    for c in range(n_layers):
        w = param_refs[2 * c][...]           # (in, out) — already transposed on the host
        b = param_refs[2 * c + 1][...]       # (1, out), f32
        acc = jnp.dot(h, w, preferred_element_type=jnp.float32) + b.astype(jnp.float32)
        if c != n_layers - 1:
            acc = _apply_act(acc, acts[c], slope)   # activation math in f32
            h = acc.astype(op_dtype)                # back to operand dtype for the next MXU pass
        else:
            h = acc
    out_ref[...] = h.astype(out_ref.dtype)


def _choose_tb(batch, *, sublane=16, min_tile_b=128, max_tile_b=512, target_steps=8):
    """Batch tile: multiple of 16 sublanes; aim for >= target_steps grid steps for big batches."""
    pb = _round_up(max(batch, 1), sublane)
    if pb <= 2 * min_tile_b:
        return pb                               # tiny batch: single tile
    tb = _round_up(-(-batch // target_steps), sublane)
    tb = max(min_tile_b, min(tb, max_tile_b))
    return min(tb, pb)


def _vmem_capacity_bytes():
    try:
        return int(pltpu.get_tpu_info().vmem_capacity_bytes)
    except Exception:
        return 64 << 20     # conservative default: v7x per-TensorCore VMEM


def mlp_forward(x, params, activations, slope=0.1, *, use_bf16_matmul=True, max_tile_b=512):
    """params: list of (W, b) with W.shape == (out_dim, in_dim), b.shape == (out_dim,)."""
    batch, in_dim = x.shape
    n_layers = len(params)
    assert len(activations) == n_layers - 1

    op_dtype = jnp.bfloat16 if use_bf16_matmul else x.dtype

    # Keep true input/output feature dims in HBM (full-extent blocks are exempt from the
    # 128-lane divisibility rule); pad only hidden dims (VMEM-only) to 128 lanes.
    dims = [in_dim] + [w.shape[0] for (w, _) in params]
    pdims = [dims[0]] + [_round_up(d, 128) for d in dims[1:-1]] + [dims[-1]]
    out_dim = pdims[-1]   # == true output dim

    tb = min(_choose_tb(batch, max_tile_b=max_tile_b), _round_up(max_tile_b, 16))
    pb = _round_up(batch, tb)
    xp = x if pb == batch else jnp.zeros((pb, in_dim), x.dtype).at[:batch].set(x)

    # Pre-transpose (+ hidden-dim zero-pad) weights on the host, cast MXU operands to
    # op_dtype once; biases stay f32 (added after f32 accumulation).
    flat = []
    for li, (w, b) in enumerate(params):
        fo_t, fi_t = w.shape
        fi, fo = pdims[li], pdims[li + 1]
        wt = jnp.zeros((fi, fo), op_dtype).at[:fi_t, :fo_t].set(w.T.astype(op_dtype))
        bp = jnp.zeros((1, fo), jnp.float32).at[:, :fo_t].set(b.reshape(1, -1).astype(jnp.float32))
        flat.append(wt)
        flat.append(bp)
    param_bytes = sum(int(a.size) * a.dtype.itemsize for a in flat)

    grid = (pb // tb,)
    out_shape = jax.ShapeDtypeStruct((pb, out_dim), x.dtype)

    # VMEM budget: double-buffered x/out tiles + resident params + f32 intermediates.
    x_tile_bytes = tb * in_dim * jnp.dtype(x.dtype).itemsize
    o_tile_bytes = tb * out_dim * jnp.dtype(x.dtype).itemsize
    inter_bytes = 2 * tb * max(pdims) * 4          # f32 dot result + activation temporary
    vmem_cap = int(_vmem_capacity_bytes() * 0.78)  # headroom for Mosaic internal scratch

    can_single_buffer = hasattr(pl, "Buffered")
    min_need = (2 * (x_tile_bytes + o_tile_bytes)
                + (1 if can_single_buffer else 2) * param_bytes
                + inter_bytes + (2 << 20))
    if min_need > vmem_cap:
        # TODO(synk): add an N-/K-tiled fallback (second grid axis over the largest layer's
        # output features with an f32 accumulator scratch + pl.when init/finalize) instead of
        # keeping every layer's weights resident, for production-size MLPs on v7x (64 MiB VMEM).
        raise ValueError(
            f"MLP weights + tiles need ~{min_need >> 20} MiB VMEM but only "
            f"~{vmem_cap >> 20} MiB is available; reduce hidden/tile size.")

    flops = 2 * pb * sum(pdims[li] * pdims[li + 1] for li in range(n_layers))
    transcendentals = sum(pb * pdims[li + 1] for li in range(n_layers - 1)
                          if activations[li] in ("xtanh", "sigmoid"))
    bytes_accessed = int(pb * in_dim * jnp.dtype(x.dtype).itemsize + param_bytes
                         + pb * out_dim * jnp.dtype(x.dtype).itemsize)
    cost = pl.CostEstimate(flops=int(flops), transcendentals=int(transcendentals),
                           bytes_accessed=bytes_accessed)

    kernel = functools.partial(mlp_kernel, n_layers=n_layers, acts=tuple(activations),
                               slope=slope, op_dtype=op_dtype)

    def build_call(resident_buffers):
        def resident_spec(shape):
            if resident_buffers == 1:
                # Constant index_map -> fetched once; single VMEM buffer instead of two.
                return pl.BlockSpec(shape, lambda i: (0, 0), pipeline_mode=pl.Buffered(1))
            return pl.BlockSpec(shape, lambda i: (0, 0))

        in_specs = [pl.BlockSpec((tb, in_dim), lambda i: (i, 0))]
        for li in range(n_layers):
            in_specs.append(resident_spec((pdims[li], pdims[li + 1])))  # weight, resident
            in_specs.append(resident_spec((1, pdims[li + 1])))          # bias, resident
        out_specs = pl.BlockSpec((tb, out_dim), lambda i: (i, 0))

        need = (2 * (x_tile_bytes + o_tile_bytes) + resident_buffers * param_bytes
                + inter_bytes + (2 << 20))
        vmem_limit = int(min(max(need + need // 2, 16 << 20), vmem_cap))

        return pl.pallas_call(
            kernel,
            out_shape=out_shape,
            grid=grid,
            in_specs=in_specs,
            out_specs=out_specs,
            compiler_params=pltpu.CompilerParams(
                dimension_semantics=("parallel",),
                vmem_limit_bytes=vmem_limit,
            ),
            cost_estimate=cost,
        )

    attempts = [1, 2] if can_single_buffer else [2]
    out_padded = None
    for idx, nbuf in enumerate(attempts):
        try:
            out_padded = jax.block_until_ready(build_call(nbuf)(xp, *flat))
            break
        except Exception:
            if idx == len(attempts) - 1:
                raise
            # pl.Buffered(1) rejected by this lowering -> retry with default double-buffering.

    return out_padded if pb == batch else out_padded[:batch]


def init_mlp_params(key, input_dim, output_dim, hidden_dim, n_layers):
    """Deterministic init mirroring torch.nn.Linear default U(-1/sqrt(fan_in), 1/sqrt(fan_in))."""
    if isinstance(hidden_dim, int):
        hidden = [hidden_dim] * (n_layers - 1)
    else:
        hidden = list(hidden_dim)

    if n_layers == 1:
        dims = [(input_dim, output_dim)]
    else:
        dims = [(input_dim, hidden[0])]
        for i in range(1, n_layers - 1):
            dims.append((hidden[i - 1], hidden[i]))
        dims.append((hidden[n_layers - 2], output_dim))

    params = []
    for (fan_in, fan_out) in dims:
        key, kw, kb = jax.random.split(key, 3)
        bound = 1.0 / (fan_in ** 0.5)
        w = jax.random.uniform(kw, (fan_out, fan_in), jnp.float32, -bound, bound)
        b = jax.random.uniform(kb, (fan_out,), jnp.float32, -bound, bound)
        params.append((w, b))
    return params


def mlp_reference(x, params, activations, slope=0.1):
    """Pure-JAX reference of the PyTorch forward (highest-precision matmuls)."""
    h = x
    n_layers = len(params)
    for c, (w, b) in enumerate(params):
        h = jnp.dot(h, w.T, precision=jax.lax.Precision.HIGHEST) + b
        if c != n_layers - 1:
            h = _apply_act(h, activations[c], slope)
    return h


if __name__ == "__main__":
    key = jax.random.PRNGKey(0)
    k_x, k_p, k_x2 = jax.random.split(key, 3)

    batch = 8
    input_dim = 16
    hidden_dim = 32
    output_dim = 8
    n_layers = 3
    slope = 0.1
    activations = ["lrelu"] * (n_layers - 1)

    x = jax.random.normal(k_x, (batch, input_dim), jnp.float32)
    params = init_mlp_params(k_p, input_dim, output_dim, hidden_dim, n_layers)
    ref = mlp_reference(x, params, activations, slope)

    # Default fast path: bf16 MXU operands, f32 accumulation.
    out = jax.block_until_ready(mlp_forward(x, params, activations, slope))
    assert out.shape == (batch, output_dim)
    assert jnp.allclose(out, ref, atol=5e-2, rtol=5e-2), "mismatch vs reference (bf16 operands)"

    # Strict f32-operand path.
    out_f32 = jax.block_until_ready(
        mlp_forward(x, params, activations, slope, use_bf16_matmul=False))
    assert jnp.allclose(out_f32, ref, atol=1e-4, rtol=1e-4), "mismatch vs reference (f32 operands)"

    # Non-trivial grid (batch=1024 -> 8 steps of 128 rows): exercises pipelining + megacore.
    batch2 = 1024
    x2 = jax.random.normal(k_x2, (batch2, input_dim), jnp.float32)
    out2 = jax.block_until_ready(mlp_forward(x2, params, activations, slope))
    ref2 = mlp_reference(x2, params, activations, slope)
    assert out2.shape == (batch2, output_dim)
    assert jnp.allclose(out2, ref2, atol=5e-2, rtol=5e-2), "mismatch vs reference (tiled)"

    # Activation coverage: xtanh + sigmoid hidden layers (EUP path), exact-operand mode.
    acts3 = ["xtanh", "sigmoid"]
    out3 = jax.block_until_ready(
        mlp_forward(x, params, acts3, slope, use_bf16_matmul=False))
    ref3 = mlp_reference(x, params, acts3, slope)
    assert jnp.allclose(out3, ref3, atol=1e-4, rtol=1e-4), "mismatch vs reference (xtanh/sigmoid)"

    print("KERNEL_OK")
</pallas_src>

<mosaic_0001>
module attributes {stable_mosaic.version = 11 : i64} {
  func.func @mlp_kernel(%arg0: i32, %arg1: memref<16x16xf32, #tpu.memory_space<vmem>>, %arg2: memref<16x128xbf16, #tpu.memory_space<vmem>>, %arg3: memref<1x128xf32, #tpu.memory_space<vmem>>, %arg4: memref<128x128xbf16, #tpu.memory_space<vmem>>, %arg5: memref<1x128xf32, #tpu.memory_space<vmem>>, %arg6: memref<128x8xbf16, #tpu.memory_space<vmem>>, %arg7: memref<1x8xf32, #tpu.memory_space<vmem>>, %arg8: memref<16x8xf32, #tpu.memory_space<vmem>>) attributes {dimension_semantics = [#tpu.dimension_semantics<parallel>], iteration_bounds = array<i64: 1>, scalar_prefetch = 0 : i64, scratch_operands = 0 : i64, tpu.core_type = #tpu.core_type<tc>, window_params = [{transform_indices = @transform_0, window_bounds = array<i64: 16, 16>}, {pipeline_mode = #tpu.pipeline_mode<synchronous>, transform_indices = @transform_1, window_bounds = array<i64: 16, 128>}, {pipeline_mode = #tpu.pipeline_mode<synchronous>, transform_indices = @transform_2, window_bounds = array<i64: 1, 128>}, {pipeline_mode = #tpu.pipeline_mode<synchronous>, transform_indices = @transform_3, window_bounds = array<i64: 128, 128>}, {pipeline_mode = #tpu.pipeline_mode<synchronous>, transform_indices = @transform_4, window_bounds = array<i64: 1, 128>}, {pipeline_mode = #tpu.pipeline_mode<synchronous>, transform_indices = @transform_5, window_bounds = array<i64: 128, 8>}, {pipeline_mode = #tpu.pipeline_mode<synchronous>, transform_indices = @transform_6, window_bounds = array<i64: 1, 8>}, {transform_indices = @transform_7, window_bounds = array<i64: 16, 8>}]} {
    %c0 = arith.constant 0 : index
    %c0_0 = arith.constant 0 : index
    %0 = vector.load %arg1[%c0, %c0_0] : memref<16x16xf32, #tpu.memory_space<vmem>>, vector<16x16xf32>
    %1 = arith.truncf %0 : vector<16x16xf32> to vector<16x16xbf16>
    %c0_1 = arith.constant 0 : index
    %c0_2 = arith.constant 0 : index
    %2 = vector.load %arg2[%c0_1, %c0_2] : memref<16x128xbf16, #tpu.memory_space<vmem>>, vector<16x128xbf16>
    %c0_3 = arith.constant 0 : index
    %c0_4 = arith.constant 0 : index
    %3 = vector.load %arg3[%c0_3, %c0_4] : memref<1x128xf32, #tpu.memory_space<vmem>>, vector<1x128xf32>
    %cst = arith.constant dense<0.000000e+00> : vector<16x128xf32>
    %4 = tpu.matmul %1, %2, %cst {dimension_numbers = #tpu.dot_dimension_numbers<[1], [0], [0], [1], [0, 0, 1, 1], [], []>} : vector<16x16xbf16>, vector<16x128xbf16>, vector<16x128xf32> -> vector<16x128xf32>
    %5 = vector.broadcast %3 : vector<1x128xf32> to vector<16x128xf32>
    %6 = arith.addf %4, %5 : vector<16x128xf32>
    %cst_5 = arith.constant 0.000000e+00 : f32
    %7 = vector.broadcast %cst_5 : f32 to vector<16x128xf32>
    %8 = arith.cmpf ogt, %6, %7 : vector<16x128xf32>
    %cst_6 = arith.constant 1.000000e-01 : f32
    %9 = vector.broadcast %cst_6 : f32 to vector<16x128xf32>
    %10 = arith.mulf %9, %6 : vector<16x128xf32>
    %11 = arith.select %8, %6, %10 : vector<16x128xi1>, vector<16x128xf32>
    %12 = arith.truncf %11 : vector<16x128xf32> to vector<16x128xbf16>
    %c0_7 = arith.constant 0 : index
    %c0_8 = arith.constant 0 : index
    %13 = vector.load %arg4[%c0_7, %c0_8] : memref<128x128xbf16, #tpu.memory_space<vmem>>, vector<128x128xbf16>
    %c0_9 = arith.constant 0 : index
    %c0_10 = arith.constant 0 : index
    %14 = vector.load %arg5[%c0_9, %c0_10] : memref<1x128xf32, #tpu.memory_space<vmem>>, vector<1x128xf32>
    %cst_11 = arith.constant dense<0.000000e+00> : vector<16x128xf32>
    %15 = tpu.matmul %12, %13, %cst_11 {dimension_numbers = #tpu.dot_dimension_numbers<[1], [0], [0], [1], [0, 0, 1, 1], [], []>} : vector<16x128xbf16>, vector<128x128xbf16>, vector<16x128xf32> -> vector<16x128xf32>
    %16 = vector.broadcast %14 : vector<1x128xf32> to vector<16x128xf32>
    %17 = arith.addf %15, %16 : vector<16x128xf32>
    %cst_12 = arith.constant 0.000000e+00 : f32
    %18 = vector.broadcast %cst_12 : f32 to vector<16x128xf32>
    %19 = arith.cmpf ogt, %17, %18 : vector<16x128xf32>
    %cst_13 = arith.constant 1.000000e-01 : f32
    %20 = vector.broadcast %cst_13 : f32 to vector<16x128xf32>
    %21 = arith.mulf %20, %17 : vector<16x128xf32>
    %22 = arith.select %19, %17, %21 : vector<16x128xi1>, vector<16x128xf32>
    %23 = arith.truncf %22 : vector<16x128xf32> to vector<16x128xbf16>
    %c0_14 = arith.constant 0 : index
    %c0_15 = arith.constant 0 : index
    %24 = vector.load %arg6[%c0_14, %c0_15] : memref<128x8xbf16, #tpu.memory_space<vmem>>, vector<128x8xbf16>
    %c0_16 = arith.constant 0 : index
    %c0_17 = arith.constant 0 : index
    %25 = vector.load %arg7[%c0_16, %c0_17] : memref<1x8xf32, #tpu.memory_space<vmem>>, vector<1x8xf32>
    %cst_18 = arith.constant dense<0.000000e+00> : vector<16x8xf32>
    %26 = tpu.matmul %23, %24, %cst_18 {dimension_numbers = #tpu.dot_dimension_numbers<[1], [0], [0], [1], [0, 0, 1, 1], [], []>} : vector<16x128xbf16>, vector<128x8xbf16>, vector<16x8xf32> -> vector<16x8xf32>
    %27 = vector.broadcast %25 : vector<1x8xf32> to vector<16x8xf32>
    %28 = arith.addf %26, %27 : vector<16x8xf32>
    %c0_19 = arith.constant 0 : index
    %c0_20 = arith.constant 0 : index
    %29 = vector.load %arg8[%c0_19, %c0_20] : memref<16x8xf32, #tpu.memory_space<vmem>>, vector<16x8xf32>
    tpu.vector_store %arg8[%c0_19, %c0_20], %28 {strides = array<i32>} : memref<16x8xf32, #tpu.memory_space<vmem>>, vector<16x8xf32>,
    return
  }
  func.func @transform_0(%arg0: i32) -> (i32, i32) {
    %c0_i32 = arith.constant 0 : i32
    %c0_i32_0 = arith.constant 0 : i32
    return %arg0, %c0_i32 : i32, i32
  }
  func.func @transform_1(%arg0: i32) -> (i32, i32) {
    %c0_i32 = arith.constant 0 : i32
    %c0_i32_0 = arith.constant 0 : i32
    %c0_i32_1 = arith.constant 0 : i32
    return %c0_i32, %c0_i32_0 : i32, i32
  }
  func.func @transform_2(%arg0: i32) -> (i32, i32) {
    %c0_i32 = arith.constant 0 : i32
    %c0_i32_0 = arith.constant 0 : i32
    %c0_i32_1 = arith.constant 0 : i32
    return %c0_i32, %c0_i32_0 : i32, i32
  }
  func.func @transform_3(%arg0: i32) -> (i32, i32) {
    %c0_i32 = arith.constant 0 : i32
    %c0_i32_0 = arith.constant 0 : i32
    %c0_i32_1 = arith.constant 0 : i32
    return %c0_i32, %c0_i32_0 : i32, i32
  }
  func.func @transform_4(%arg0: i32) -> (i32, i32) {
    %c0_i32 = arith.constant 0 : i32
    %c0_i32_0 = arith.constant 0 : i32
    %c0_i32_1 = arith.constant 0 : i32
    return %c0_i32, %c0_i32_0 : i32, i32
  }
  func.func @transform_5(%arg0: i32) -> (i32, i32) {
    %c0_i32 = arith.constant 0 : i32
    %c0_i32_0 = arith.constant 0 : i32
    %c0_i32_1 = arith.constant 0 : i32
    return %c0_i32, %c0_i32_0 : i32, i32
  }
  func.func @transform_6(%arg0: i32) -> (i32, i32) {
    %c0_i32 = arith.constant 0 : i32
    %c0_i32_0 = arith.constant 0 : i32
    %c0_i32_1 = arith.constant 0 : i32
    return %c0_i32, %c0_i32_0 : i32, i32
  }
  func.func @transform_7(%arg0: i32) -> (i32, i32) {
    %c0_i32 = arith.constant 0 : i32
    %c0_i32_0 = arith.constant 0 : i32
    return %arg0, %c0_i32 : i32, i32
  }
}

module attributes {stable_mosaic.version = 11 : i64} {
  func.func @mlp_kernel(%arg0: i32, %arg1: memref<16x16xf32, #tpu.memory_space<vmem>>, %arg2: memref<16x128xbf16, #tpu.memory_space<vmem>>, %arg3: memref<1x128xf32, #tpu.memory_space<vmem>>, %arg4: memref<128x128xbf16, #tpu.memory_space<vmem>>, %arg5: memref<1x128xf32, #tpu.memory_space<vmem>>, %arg6: memref<128x8xbf16, #tpu.memory_space<vmem>>, %arg7: memref<1x8xf32, #tpu.memory_space<vmem>>, %arg8: memref<16x8xf32, #tpu.memory_space<vmem>>) attributes {dimension_semantics = [#tpu.dimension_semantics<parallel>], iteration_bounds = array<i64: 1>, scalar_prefetch = 0 : i64, scratch_operands = 0 : i64, tpu.core_type = #tpu.core_type<tc>, window_params = [{transform_indices = @transform_0, window_bounds = array<i64: 16, 16>}, {pipeline_mode = #tpu.pipeline_mode<synchronous>, transform_indices = @transform_1, window_bounds = array<i64: 16, 128>}, {pipeline_mode = #tpu.pipeline_mode<synchronous>, transform_indices = @transform_2, window_bounds = array<i64: 1, 128>}, {pipeline_mode = #tpu.pipeline_mode<synchronous>, transform_indices = @transform_3, window_bounds = array<i64: 128, 128>}, {pipeline_mode = #tpu.pipeline_mode<synchronous>, transform_indices = @transform_4, window_bounds = array<i64: 1, 128>}, {pipeline_mode = #tpu.pipeline_mode<synchronous>, transform_indices = @transform_5, window_bounds = array<i64: 128, 8>}, {pipeline_mode = #tpu.pipeline_mode<synchronous>, transform_indices = @transform_6, window_bounds = array<i64: 1, 8>}, {transform_indices = @transform_7, window_bounds = array<i64: 16, 8>}]} {
    %c0 = arith.constant 0 : index
    %c0_0 = arith.constant 0 : index
    %0 = vector.load %arg1[%c0, %c0_0] : memref<16x16xf32, #tpu.memory_space<vmem>>, vector<16x16xf32>
    %1 = arith.truncf %0 : vector<16x16xf32> to vector<16x16xbf16>
    %c0_1 = arith.constant 0 : index
    %c0_2 = arith.constant 0 : index
    %2 = vector.load %arg2[%c0_1, %c0_2] : memref<16x128xbf16, #tpu.memory_space<vmem>>, vector<16x128xbf16>
    %c0_3 = arith.constant 0 : index
    %c0_4 = arith.constant 0 : index
    %3 = vector.load %arg3[%c0_3, %c0_4] : memref<1x128xf32, #tpu.memory_space<vmem>>, vector<1x128xf32>
    %cst = arith.constant dense<0.000000e+00> : vector<16x128xf32>
    %4 = tpu.matmul %1, %2, %cst {dimension_numbers = #tpu.dot_dimension_numbers<[1], [0], [0], [1], [0, 0, 1, 1], [], []>} : vector<16x16xbf16>, vector<16x128xbf16>, vector<16x128xf32> -> vector<16x128xf32>
    %5 = vector.broadcast %3 : vector<1x128xf32> to vector<16x128xf32>
    %6 = arith.addf %4, %5 : vector<16x128xf32>
    %cst_5 = arith.constant 0.000000e+00 : f32
    %7 = vector.broadcast %cst_5 : f32 to vector<16x128xf32>
    %8 = arith.cmpf ogt, %6, %7 : vector<16x128xf32>
    %cst_6 = arith.constant 1.000000e-01 : f32
    %9 = vector.broadcast %cst_6 : f32 to vector<16x128xf32>
    %10 = arith.mulf %9, %6 : vector<16x128xf32>
    %11 = arith.select %8, %6, %10 : vector<16x128xi1>, vector<16x128xf32>
    %12 = arith.truncf %11 : vector<16x128xf32> to vector<16x128xbf16>
    %c0_7 = arith.constant 0 : index
    %c0_8 = arith.constant 0 : index
    %13 = vector.load %arg4[%c0_7, %c0_8] : memref<128x128xbf16, #tpu.memory_space<vmem>>, vector<128x128xbf16>
    %c0_9 = arith.constant 0 : index
    %c0_10 = arith.constant 0 : index
    %14 = vector.load %arg5[%c0_9, %c0_10] : memref<1x128xf32, #tpu.memory_space<vmem>>, vector<1x128xf32>
    %cst_11 = arith.constant dense<0.000000e+00> : vector<16x128xf32>
    %15 = tpu.matmul %12, %13, %cst_11 {dimension_numbers = #tpu.dot_dimension_numbers<[1], [0], [0], [1], [0, 0, 1, 1], [], []>} : vector<16x128xbf16>, vector<128x128xbf16>, vector<16x128xf32> -> vector<16x128xf32>
    %16 = vector.broadcast %14 : vector<1x128xf32> to vector<16x128xf32>
    %17 = arith.addf %15, %16 : vector<16x128xf32>
    %cst_12 = arith.constant 0.000000e+00 : f32
    %18 = vector.broadcast %cst_12 : f32 to vector<16x128xf32>
    %19 = arith.cmpf ogt, %17, %18 : vector<16x128xf32>
    %cst_13 = arith.constant 1.000000e-01 : f32
    %20 = vector.broadcast %cst_13 : f32 to vector<16x128xf32>
    %21 = arith.mulf %20, %17 : vector<16x128xf32>
    %22 = arith.select %19, %17, %21 : vector<16x128xi1>, vector<16x128xf32>
    %23 = arith.truncf %22 : vector<16x128xf32> to vector<16x128xbf16>
    %c0_14 = arith.constant 0 : index
    %c0_15 = arith.constant 0 : index
    %24 = vector.load %arg6[%c0_14, %c0_15] : memref<128x8xbf16, #tpu.memory_space<vmem>>, vector<128x8xbf16>
    %c0_16 = arith.constant 0 : index
    %c0_17 = arith.constant 0 : index
    %25 = vector.load %arg7[%c0_16, %c0_17] : memref<1x8xf32, #tpu.memory_space<vmem>>, vector<1x8xf32>
    %cst_18 = arith.constant dense<0.000000e+00> : vector<16x8xf32>
    %26 = tpu.matmul %23, %24, %cst_18 {dimension_numbers = #tpu.dot_dimension_numbers<[1], [0], [0], [1], [0, 0, 1, 1], [], []>} : vector<16x128xbf16>, vector<128x8xbf16>, vector<16x8xf32> -> vector<16x8xf32>
    %27 = vector.broadcast %25 : vector<1x8xf32> to vector<16x8xf32>
    %28 = arith.addf %26, %27 : vector<16x8xf32>
    %c0_19 = arith.constant 0 : index
    %c0_20 = arith.constant 0 : index
    %29 = vector.load %arg8[%c0_19, %c0_20] : memref<16x8xf32, #tpu.memory_space<vmem>>, vector<16x8xf32>
    tpu.vector_store %arg8[%c0_19, %c0_20], %28 {strides = array<i32>} : memref<16x8xf32, #tpu.memory_space<vmem>>, vector<16x8xf32>,
    return
  }
  func.func @transform_0(%arg0: i32) -> (i32, i32) {
    %c0_i32 = arith.constant 0 : i32
    %c0_i32_0 = arith.constant 0 : i32
    return %arg0, %c0_i32 : i32, i32
  }
  func.func @transform_1(%arg0: i32) -> (i32, i32) {
    %c0_i32 = arith.constant 0 : i32
    %c0_i32_0 = arith.constant 0 : i32
    %c0_i32_1 = arith.constant 0 : i32
    return %c0_i32, %c0_i32_0 : i32, i32
  }
  func.func @transform_2(%arg0: i32) -> (i32, i32) {
    %c0_i32 = arith.constant 0 : i32
    %c0_i32_0 = arith.constant 0 : i32
    %c0_i32_1 = arith.constant 0 : i32
    return %c0_i32, %c0_i32_0 : i32, i32
  }
  func.func @transform_3(%arg0: i32) -> (i32, i32) {
    %c0_i32 = arith.constant 0 : i32
    %c0_i32_0 = arith.constant 0 : i32
    %c0_i32_1 = arith.constant 0 : i32
    return %c0_i32, %c0_i32_0 : i32, i32
  }
  func.func @transform_4(%arg0: i32) -> (i32, i32) {
    %c0_i32 = arith.constant 0 : i32
    %c0_i32_0 = arith.constant 0 : i32
    %c0_i32_1 = arith.constant 0 : i32
    return %c0_i32, %c0_i32_0 : i32, i32
  }
  func.func @transform_5(%arg0: i32) -> (i32, i32) {
    %c0_i32 = arith.constant 0 : i32
    %c0_i32_0 = arith.constant 0 : i32
    %c0_i32_1 = arith.constant 0 : i32
    return %c0_i32, %c0_i32_0 : i32, i32
  }
  func.func @transform_6(%arg0: i32) -> (i32, i32) {
    %c0_i32 = arith.constant 0 : i32
    %c0_i32_0 = arith.constant 0 : i32
    %c0_i32_1 = arith.constant 0 : i32
    return %c0_i32, %c0_i32_0 : i32, i32
  }
  func.func @transform_7(%arg0: i32) -> (i32, i32) {
    %c0_i32 = arith.constant 0 : i32
    %c0_i32_0 = arith.constant 0 : i32
    return %arg0, %c0_i32 : i32, i32
  }
}

</mosaic_0001>

<bundles_post_ra>
// kernel: tpu_custom_call.1
= control target key start
LH: loop header
LB: loop body
LE: loop exit
PB: predicated region body
PF: predicated region fallthrough
CT: control target
= control target key end

     0   :  { %12 = vsyncpa [#allocation3], 0  ;;  %s483_s24 = smov [#allocation2]   ;;  %s629_s0 = inlined_call_operand.hbm [shape: f32[16,16], index: 0, kind: input, shape index: {}]   ;;  %s630_s1 = inlined_call_operand.vmem [shape: bf16[16,128], index: 1, kind: input, shape index: {}]   ;;  %s631_s2 = inlined_call_operand.vmem [shape: f32[1,128], index: 2, kind: input, shape index: {}]   ;;  %s632_s3 = inlined_call_operand.vmem [shape: bf16[128,128], index: 3, kind: input, shape index: {}]   ;;  %s633_s4 = inlined_call_operand.vmem [shape: f32[1,128], index: 4, kind: input, shape index: {}]   ;;  %s634_s5 = inlined_call_operand.vmem [shape: bf16[128,8], index: 5, kind: input, shape index: {}]   ;;  %s635_s6 = inlined_call_operand.vmem [shape: f32[1,8], index: 6, kind: input, shape index: {}]   ;;  %s636_s7 = inlined_call_operand.vmem [shape: f32[16,8], index: 7, kind: output, shape index: {}]  }
   0x1   :  { %s18_s25 = sshll.u32 %s483_s24, 4  ;;  %s459_s28 = scalar_lea.hbm %s629_s0, 256  ;;  %s19_s25 = int_to_ptr.vmem [resolvable:$true] %s18_s25 }
   0x2   :  { %p460_p0 = scmp.ne.s32.totalorder %s629_s0, %s459_s28  ;;  %p463_p1 = scmp.lt.u32.totalorder %s459_s28, %s629_s0 }
   0x4   :  { %p465_p2 = pnand %p463_p1, %p460_p0 }
   0x6   :  { %468 = shalt.err (!%p465_p2)
}
   0x7   :  { %s469_s10 = scalar_lea.vmem %s19_s25, 256  ;;  %p474_p4 = scmp.lt.s32.totalorder %s19_s25, %s19_s25 }
   0x8   :  { %p470_p3 = scmp.ne.s32.totalorder %s19_s25, %s469_s10  ;;  %p475_p5 = scmp.lt.s32.totalorder %s469_s10, %s469_s10 }
   0xa   :  { %p476_p6 = por %p475_p5, %p474_p4 }
   0xc   :  { %p477_p7 = pnand %p476_p6, %p470_p3 }
   0xe   :  { %480 = shalt.err (!%p477_p7)
}
   0xf   :  { %s484_s11 = smov 128   ;;  %s485_s12 = smov 8  }
  0x10   :  { %24 = dma.hbm_to_vmem [thread:$0]  %s629_s0, 256, %s19_s25, [#allocation3], %s484_s11, %s484_s11, %s485_s12  }
  0x11   :  { %481 = dma.done.wait [#allocation3], 256  }
  0x12   :  { %482 = vsyncadd [#allocation3], 4294967040  ;;  %v486_v0 = vmov 0.0   ;;  %vm487_vm0 = vmmov 0   ;;  %v442_v1 = vld [vmem:[%s630_s1] sm:$0xff]   ;;  %v42_v3 = vld [vmem:[#allocation2 + $0x8] sm:$0xff] }
  0x13   :  { %391 = vmatprep.subr.bf16.mxu0 %v486_v0  ;;  %393 = vmatprep.mubr.msk.bf16.mxu0 %vm487_vm0, %v486_v0  ;;  %v41_v2 = vld [vmem:[#allocation2] sm:$0xff]  ;;  %vm59_vm1 = vcmask 130048   ;;  %v444_v6 = vld [vmem:[%s632_s3 + $0x8] sm:$0xff]   ;;  %v445_v7 = vld [vmem:[%s632_s3 + $0x10] sm:$0xff]   ;;  %vm342_vm6 = vcmask 64512  }
  0x14   :  { %397 = vmatprep.subr.bf16.mxu1 %v486_v0  ;;  %413 = vmatprep.mubr.msk.bf16.mxu1 %vm487_vm0, %v486_v0  ;;  %v43_v4 = vpack.c.bf16 %v42_v3, %v41_v2  ;;  %v443_v5 = vld [vmem:[%s632_s3] sm:$0xff]   ;;  %v446_v8 = vld [vmem:[%s632_s3 + $0x18] sm:$0xff]   ;;  %v448_v10 = vld [vmem:[%s632_s3 + $0x28] sm:$0xff]  }
  0x15   :  { %392 = vmatpush3.bf16.msra.mxu0 %v442_v1  ;;  %398 = vmatpush3.bf16.msra.mxu1 %v443_v5  ;;  %v447_v9 = vld [vmem:[%s632_s3 + $0x20] sm:$0xff]   ;;  %v449_v11 = vld [vmem:[%s632_s3 + $0x30] sm:$0xff]   ;;  %v450_v12 = vld [vmem:[%s632_s3 + $0x38] sm:$0xff]  }
  0x16   :  { %417 = vmatprep.subr.bf16.mxu0 %v486_v0  ;;  %399 = vmatprep.subr.bf16.mxu1 %v486_v0  ;;  %v451_v13 = vld [vmem:[%s634_s5] sm:$0xff]   ;;  %v452_v14 = vld [vmem:[%s634_s5 + $0x8] sm:$0xff]   ;;  %v453_v15 = vld [vmem:[%s634_s5 + $0x10] sm:$0xff]  }
  0x17   :  { %v454_v16 = vld [vmem:[%s634_s5 + $0x18] sm:$0xff]   ;;  %v455_v17 = vld [vmem:[%s634_s5 + $0x20] sm:$0xff]   ;;  %v456_v18 = vld [vmem:[%s634_s5 + $0x28] sm:$0xff]  }
  0x18   :  { %394 = vmatmul.mubr.msk.bf16.vlgmr.msra.gmra.mrb[0].mxu0 %vm59_vm1, %v43_v4  ;;  %v350_v19 = vld [vmem:[%s631_s2] ss:$0 sm:$0xff]  ;;  %v457_v31 = vld [vmem:[%s634_s5 + $0x30] sm:$0xff]   ;;  %v458_v32 = vld [vmem:[%s634_s5 + $0x38] sm:$0xff]  }
  0x19   :  { %433 = vmatprep.mubr.msk.bf16.mxu0 %vm487_vm0, %v486_v0  ;;  %400 = vmatpush3.bf16.msra.mxu1 %v444_v6  ;;  %v353_v33 = vld [vmem:[%s633_s4] ss:$0 sm:$0xff] }
  0x1a   :  { %401 = vmatprep.subr.bf16.mxu1 %v486_v0  ;;  %418 = vmatpush3.bf16.msra.mxu0 %v451_v13  ;;  %v362_v45 = vld [vmem:[%s635_s6] ss:$0 sm:$0xff] }
  0x1b   :  { %419 = vmatprep.subr.bf16.mxu0 %v486_v0 }
  0x1d   :  { %402 = vmatpush3.bf16.msra.mxu1 %v445_v7 }
  0x1e   :  { %403 = vmatprep.subr.bf16.mxu1 %v486_v0  ;;  %420 = vmatpush3.bf16.msra.mxu0 %v452_v14 }
  0x1f   :  { %421 = vmatprep.subr.bf16.mxu0 %v486_v0 }
  0x21   :  { %404 = vmatpush3.bf16.msra.mxu1 %v446_v8 }
  0x22   :  { %405 = vmatprep.subr.bf16.mxu1 %v486_v0  ;;  %422 = vmatpush3.bf16.msra.mxu0 %v453_v15 }
  0x23   :  { %423 = vmatprep.subr.bf16.mxu0 %v486_v0 }
  0x25   :  { %406 = vmatpush3.bf16.msra.mxu1 %v447_v9 }
  0x26   :  { %407 = vmatprep.subr.bf16.mxu1 %v486_v0  ;;  %424 = vmatpush3.bf16.msra.mxu0 %v454_v16 }
  0x27   :  { %425 = vmatprep.subr.bf16.mxu0 %v486_v0 }
  0x29   :  { %408 = vmatpush3.bf16.msra.mxu1 %v448_v10 }
  0x2a   :  { %409 = vmatprep.subr.bf16.mxu1 %v486_v0  ;;  %426 = vmatpush3.bf16.msra.mxu0 %v455_v17 }
  0x2b   :  { %427 = vmatprep.subr.bf16.mxu0 %v486_v0 }
  0x2d   :  { %410 = vmatpush3.bf16.msra.mxu1 %v449_v11 }
  0x2e   :  { %411 = vmatprep.subr.bf16.mxu1 %v486_v0  ;;  %428 = vmatpush3.bf16.msra.mxu0 %v456_v18 }
  0x2f   :  { %429 = vmatprep.subr.bf16.mxu0 %v486_v0 }
  0x31   :  { %412 = vmatpush3.bf16.msra.mxu1 %v450_v12 }
  0x32   :  { %430 = vmatpush3.bf16.msra.mxu0 %v457_v31 }
  0x33   :  { %431 = vmatprep.subr.bf16.mxu0 %v486_v0 }
  0x36   :  { %432 = vmatpush3.bf16.msra.mxu0 %v458_v32 }
  0xeb   :  { %v97_v20 = vpop.f32.mrb[0].mxu0 }
  0xec   :  { %v98_v21 = vadd.f32 %v350_v19, %v97_v20  ;;  %v395_v22 = vpop.f32.mrb[1].mxu0 }
  0xed   :  { %v100_v23 = vpop.f32.mrb[2].mxu0 }
  0xee   :  { %v106_v24 = vmul.f32 0.1, %v98_v21  ;;  %v101_v25 = vadd.f32 %v350_v19, %v100_v23  ;;  %v396_v26 = vpop.f32.mrb[3].mxu0  ;;  %vm104_vm2 = vcmp.gt.f32.partialorder %v98_v21, 0.0 }
  0xf0   :  { %vm105_vm3 = vcmp.gt.f32.partialorder %v101_v25, 0.0  ;;  %v107_v27 = vmul.f32 0.1, %v101_v25  ;;  %v108_v28 = vsel %vm104_vm2, %v98_v21, %v106_v24 }
  0xf2   :  { %v109_v29 = vsel %vm105_vm3, %v101_v25, %v107_v27 }
  0xf3   :  { %v110_v30 = vpack.c.bf16 %v109_v29, %v108_v28 }
  0xf5   :  { %414 = vmatmul.mubr.bf16.vlgmr.msra.gmra.mrb[0].mxu1 %v110_v30 }
 0x1c8   :  { %v216_v34 = vpop.f32.mrb[0].mxu1 }
 0x1c9   :  { %v217_v35 = vadd.f32 %v353_v33, %v216_v34  ;;  %v415_v36 = vpop.f32.mrb[1].mxu1 }
 0x1ca   :  { %v219_v37 = vpop.f32.mrb[2].mxu1 }
 0x1cb   :  { %v225_v38 = vmul.f32 0.1, %v217_v35  ;;  %v220_v39 = vadd.f32 %v353_v33, %v219_v37  ;;  %v416_v40 = vpop.f32.mrb[3].mxu1  ;;  %vm223_vm4 = vcmp.gt.f32.partialorder %v217_v35, 0.0 }
 0x1cd   :  { %vm224_vm5 = vcmp.gt.f32.partialorder %v220_v39, 0.0  ;;  %v226_v41 = vmul.f32 0.1, %v220_v39  ;;  %v227_v42 = vsel %vm223_vm4, %v217_v35, %v225_v38 }
 0x1cf   :  { %v228_v43 = vsel %vm224_vm5, %v220_v39, %v226_v41 }
 0x1d0   :  { %v229_v44 = vpack.c.bf16 %v228_v43, %v227_v42 }
 0x1d2   :  { %434 = vmatmul.mubr.bf16.vlgmr.msra.gmra.mrb[4].mxu0 %v229_v44 }
 0x2a5   :  { %v335_v46 = vpop.f32.mrb[4].mxu0 }
 0x2a6   :  { %v336_v47 = vadd.f32 %v362_v45, %v335_v46  ;;  %v435_v48 = vpop.f32.mrb[5].mxu0 }
 0x2a7   :  { %v338_v49 = vpop.f32.mrb[6].mxu0 }
 0x2a8   :  { %343 = vst.msk [vmem:[%s636_s7] sm:$0xff] %vm342_vm6, %v336_v47  ;;  %v339_v50 = vadd.f32 %v362_v45, %v338_v49  ;;  %v436_v51 = vpop.f32.mrb[7].mxu0 }
 0x2aa   :  { %344 = vst.msk [vmem:[%s636_s7 + $0x8] sm:$0xff] %vm342_vm6, %v339_v50 }
 0x2ab   :  { %349 = vsyncpa [#allocation3], 1 }

// kernel: tpu_custom_call.1
= control target key start
LH: loop header
LB: loop body
LE: loop exit
PB: predicated region body
PF: predicated region fallthrough
CT: control target
= control target key end

     0   :  { %12 = vsyncpa [#allocation3], 0  ;;  %s483_s24 = smov [#allocation2]   ;;  %s629_s0 = inlined_call_operand.hbm [shape: f32[16,16], index: 0, kind: input, shape index: {}]   ;;  %s630_s1 = inlined_call_operand.vmem [shape: bf16[16,128], index: 1, kind: input, shape index: {}]   ;;  %s631_s2 = inlined_call_operand.vmem [shape: f32[1,128], index: 2, kind: input, shape index: {}]   ;;  %s632_s3 = inlined_call_operand.vmem [shape: bf16[128,128], index: 3, kind: input, shape index: {}]   ;;  %s633_s4 = inlined_call_operand.vmem [shape: f32[1,128], index: 4, kind: input, shape index: {}]   ;;  %s634_s5 = inlined_call_operand.vmem [shape: bf16[128,8], index: 5, kind: input, shape index: {}]   ;;  %s635_s6 = inlined_call_operand.vmem [shape: f32[1,8], index: 6, kind: input, shape index: {}]   ;;  %s636_s7 = inlined_call_operand.vmem [shape: f32[16,8], index: 7, kind: output, shape index: {}]  }
   0x1   :  { %s18_s25 = sshll.u32 %s483_s24, 4  ;;  %s459_s28 = scalar_lea.hbm %s629_s0, 256  ;;  %s19_s25 = int_to_ptr.vmem [resolvable:$true] %s18_s25 }
   0x2   :  { %p460_p0 = scmp.ne.s32.totalorder %s629_s0, %s459_s28  ;;  %p463_p1 = scmp.lt.u32.totalorder %s459_s28, %s629_s0 }
   0x4   :  { %p465_p2 = pnand %p463_p1, %p460_p0 }
   0x6   :  { %468 = shalt.err (!%p465_p2)
}
   0x7   :  { %s469_s10 = scalar_lea.vmem %s19_s25, 256  ;;  %p474_p4 = scmp.lt.s32.totalorder %s19_s25, %s19_s25 }
   0x8   :  { %p470_p3 = scmp.ne.s32.totalorder %s19_s25, %s469_s10  ;;  %p475_p5 = scmp.lt.s32.totalorder %s469_s10, %s469_s10 }
   0xa   :  { %p476_p6 = por %p475_p5, %p474_p4 }
   0xc   :  { %p477_p7 = pnand %p476_p6, %p470_p3 }
   0xe   :  { %480 = shalt.err (!%p477_p7)
}
   0xf   :  { %s484_s11 = smov 128   ;;  %s485_s12 = smov 8  }
  0x10   :  { %24 = dma.hbm_to_vmem [thread:$0]  %s629_s0, 256, %s19_s25, [#allocation3], %s484_s11, %s484_s11, %s485_s12  }
  0x11   :  { %481 = dma.done.wait [#allocation3], 256  }
  0x12   :  { %482 = vsyncadd [#allocation3], 4294967040  ;;  %v486_v0 = vmov 0.0   ;;  %vm487_vm0 = vmmov 0   ;;  %v442_v1 = vld [vmem:[%s630_s1] sm:$0xff]   ;;  %v42_v3 = vld [vmem:[#allocation2 + $0x8] sm:$0xff] }
  0x13   :  { %391 = vmatprep.subr.bf16.mxu0 %v486_v0  ;;  %393 = vmatprep.mubr.msk.bf16.mxu0 %vm487_vm0, %v486_v0  ;;  %v41_v2 = vld [vmem:[#allocation2] sm:$0xff]  ;;  %vm59_vm1 = vcmask 130048   ;;  %v444_v6 = vld [vmem:[%s632_s3 + $0x8] sm:$0xff]   ;;  %v445_v7 = vld [vmem:[%s632_s3 + $0x10] sm:$0xff]   ;;  %vm342_vm6 = vcmask 64512  }
  0x14   :  { %397 = vmatprep.subr.bf16.mxu1 %v486_v0  ;;  %413 = vmatprep.mubr.msk.bf16.mxu1 %vm487_vm0, %v486_v0  ;;  %v43_v4 = vpack.c.bf16 %v42_v3, %v41_v2  ;;  %v443_v5 = vld [vmem:[%s632_s3] sm:$0xff]   ;;  %v446_v8 = vld [vmem:[%s632_s3 + $0x18] sm:$0xff]   ;;  %v448_v10 = vld [vmem:[%s632_s3 + $0x28] sm:$0xff]  }
  0x15   :  { %392 = vmatpush3.bf16.msra.mxu0 %v442_v1  ;;  %398 = vmatpush3.bf16.msra.mxu1 %v443_v5  ;;  %v447_v9 = vld [vmem:[%s632_s3 + $0x20] sm:$0xff]   ;;  %v449_v11 = vld [vmem:[%s632_s3 + $0x30] sm:$0xff]   ;;  %v450_v12 = vld [vmem:[%s632_s3 + $0x38] sm:$0xff]  }
  0x16   :  { %417 = vmatprep.subr.bf16.mxu0 %v486_v0  ;;  %399 = vmatprep.subr.bf16.mxu1 %v486_v0  ;;  %v451_v13 = vld [vmem:[%s634_s5] sm:$0xff]   ;;  %v452_v14 = vld [vmem:[%s634_s5 + $0x8] sm:$0xff]   ;;  %v453_v15 = vld [vmem:[%s634_s5 + $0x10] sm:$0xff]  }
  0x17   :  { %v454_v16 = vld [vmem:[%s634_s5 + $0x18] sm:$0xff]   ;;  %v455_v17 = vld [vmem:[%s634_s5 + $0x20] sm:$0xff]   ;;  %v456_v18 = vld [vmem:[%s634_s5 + $0x28] sm:$0xff]  }
  0x18   :  { %394 = vmatmul.mubr.msk.bf16.vlgmr.msra.gmra.mrb[0].mxu0 %vm59_vm1, %v43_v4  ;;  %v350_v19 = vld [vmem:[%s631_s2] ss:$0 sm:$0xff]  ;;  %v457_v31 = vld [vmem:[%s634_s5 + $0x30] sm:$0xff]   ;;  %v458_v32 = vld [vmem:[%s634_s5 + $0x38] sm:$0xff]  }
  0x19   :  { %433 = vmatprep.mubr.msk.bf16.mxu0 %vm487_vm0, %v486_v0  ;;  %400 = vmatpush3.bf16.msra.mxu1 %v444_v6  ;;  %v353_v33 = vld [vmem:[%s633_s4] ss:$0 sm:$0xff] }
  0x1a   :  { %401 = vmatprep.subr.bf16.mxu1 %v486_v0  ;;  %418 = vmatpush3.bf16.msra.mxu0 %v451_v13  ;;  %v362_v45 = vld [vmem:[%s635_s6] ss:$0 sm:$0xff] }
  0x1b   :  { %419 = vmatprep.subr.bf16.mxu0 %v486_v0 }
  0x1d   :  { %402 = vmatpush3.bf16.msra.mxu1 %v445_v7 }
  0x1e   :  { %403 = vmatprep.subr.bf16.mxu1 %v486_v0  ;;  %420 = vmatpush3.bf16.msra.mxu0 %v452_v14 }
  0x1f   :  { %421 = vmatprep.subr.bf16.mxu0 %v486_v0 }
  0x21   :  { %404 = vmatpush3.bf16.msra.mxu1 %v446_v8 }
  0x22   :  { %405 = vmatprep.subr.bf16.mxu1 %v486_v0  ;;  %422 = vmatpush3.bf16.msra.mxu0 %v453_v15 }
  0x23   :  { %423 = vmatprep.subr.bf16.mxu0 %v486_v0 }
  0x25   :  { %406 = vmatpush3.bf16.msra.mxu1 %v447_v9 }
  0x26   :  { %407 = vmatprep.subr.bf16.mxu1 %v486_v0  ;;  %424 = vmatpush3.bf16.msra.mxu0 %v454_v16 }
  0x27   :  { %425 = vmatprep.subr.bf16.mxu0 %v486_v0 }
  0x29   :  { %408 = vmatpush3.bf16.msra.mxu1 %v448_v10 }
  0x2a   :  { %409 = vmatprep.subr.bf16.mxu1 %v486_v0  ;;  %426 = vmatpush3.bf16.msra.mxu0 %v455_v17 }
  0x2b   :  { %427 = vmatprep.subr.bf16.mxu0 %v486_v0 }
  0x2d   :  { %410 = vmatpush3.bf16.msra.mxu1 %v449_v11 }
  0x2e   :  { %411 = vmatprep.subr.bf16.mxu1 %v486_v0  ;;  %428 = vmatpush3.bf16.msra.mxu0 %v456_v18 }
  0x2f   :  { %429 = vmatprep.subr.bf16.mxu0 %v486_v0 }
  0x31   :  { %412 = vmatpush3.bf16.msra.mxu1 %v450_v12 }
  0x32   :  { %430 = vmatpush3.bf16.msra.mxu0 %v457_v31 }
  0x33   :  { %431 = vmatprep.subr.bf16.mxu0 %v486_v0 }
  0x36   :  { %432 = vmatpush3.bf16.msra.mxu0 %v458_v32 }
  0xeb   :  { %v97_v20 = vpop.f32.mrb[0].mxu0 }
  0xec   :  { %v98_v21 = vadd.f32 %v350_v19, %v97_v20  ;;  %v395_v22 = vpop.f32.mrb[1].mxu0 }
  0xed   :  { %v100_v23 = vpop.f32.mrb[2].mxu0 }
  0xee   :  { %v106_v24 = vmul.f32 0.1, %v98_v21  ;;  %v101_v25 = vadd.f32 %v350_v19, %v100_v23  ;;  %v396_v26 = vpop.f32.mrb[3].mxu0  ;;  %vm104_vm2 = vcmp.gt.f32.partialorder %v98_v21, 0.0 }
  0xf0   :  { %vm105_vm3 = vcmp.gt.f32.partialorder %v101_v25, 0.0  ;;  %v107_v27 = vmul.f32 0.1, %v101_v25  ;;  %v108_v28 = vsel %vm104_vm2, %v98_v21, %v106_v24 }
  0xf2   :  { %v109_v29 = vsel %vm105_vm3, %v101_v25, %v107_v27 }
  0xf3   :  { %v110_v30 = vpack.c.bf16 %v109_v29, %v108_v28 }
  0xf5   :  { %414 = vmatmul.mubr.bf16.vlgmr.msra.gmra.mrb[0].mxu1 %v110_v30 }
 0x1c8   :  { %v216_v34 = vpop.f32.mrb[0].mxu1 }
 0x1c9   :  { %v217_v35 = vadd.f32 %v353_v33, %v216_v34  ;;  %v415_v36 = vpop.f32.mrb[1].mxu1 }
 0x1ca   :  { %v219_v37 = vpop.f32.mrb[2].mxu1 }
 0x1cb   :  { %v225_v38 = vmul.f32 0.1, %v217_v35  ;;  %v220_v39 = vadd.f32 %v353_v33, %v219_v37  ;;  %v416_v40 = vpop.f32.mrb[3].mxu1  ;;  %vm223_vm4 = vcmp.gt.f32.partialorder %v217_v35, 0.0 }
 0x1cd   :  { %vm224_vm5 = vcmp.gt.f32.partialorder %v220_v39, 0.0  ;;  %v226_v41 = vmul.f32 0.1, %v220_v39  ;;  %v227_v42 = vsel %vm223_vm4, %v217_v35, %v225_v38 }
 0x1cf   :  { %v228_v43 = vsel %vm224_vm5, %v220_v39, %v226_v41 }
 0x1d0   :  { %v229_v44 = vpack.c.bf16 %v228_v43, %v227_v42 }
 0x1d2   :  { %434 = vmatmul.mubr.bf16.vlgmr.msra.gmra.mrb[4].mxu0 %v229_v44 }
 0x2a5   :  { %v335_v46 = vpop.f32.mrb[4].mxu0 }
 0x2a6   :  { %v336_v47 = vadd.f32 %v362_v45, %v335_v46  ;;  %v435_v48 = vpop.f32.mrb[5].mxu0 }
 0x2a7   :  { %v338_v49 = vpop.f32.mrb[6].mxu0 }
 0x2a8   :  { %343 = vst.msk [vmem:[%s636_s7] sm:$0xff] %vm342_vm6, %v336_v47  ;;  %v339_v50 = vadd.f32 %v362_v45, %v338_v49  ;;  %v436_v51 = vpop.f32.mrb[7].mxu0 }
 0x2aa   :  { %344 = vst.msk [vmem:[%s636_s7 + $0x8] sm:$0xff] %vm342_vm6, %v339_v50 }
 0x2ab   :  { %349 = vsyncpa [#allocation3], 1 }

</bundles_post_ra>
